<compile_context>
chip_gen: v7x
topology: tpu7x:2x2x1
jax: 0.10.0
libtpu: 0.0.40
codegen_flags: <defaults>
</compile_context>

<pallas_src>
import jax
import jax.numpy as jnp
from jax.experimental import pallas as pl
from jax.experimental.pallas import tpu as pltpu


def fbank_aug_kernel(tpos_ref, tlen_ref, fpos_ref, flen_ref, x_ref, o_ref):
    # tpos/tlen/fpos/flen: SMEM int32[(B_pad,)] scalar-prefetch refs
    # x_ref / o_ref: VMEM (TB, F_pad, T_pad) tiles for the current batch group
    TB, F_pad, T_pad = x_ref.shape
    b0 = pl.program_id(0) * TB

    # Slim 1-D index planes (broadcast later): (1, T_pad) and (F_pad, 1).
    t_idx = jax.lax.broadcasted_iota(jnp.int32, (1, T_pad), 1)
    f_idx = jax.lax.broadcasted_iota(jnp.int32, (F_pad, 1), 0)

    zero = jnp.zeros([], x_ref.dtype)

    # TB is a small static constant -> static unroll; each iteration does one
    # full-width (F_pad, T_pad) lane-dense load + select + store.
    for j in range(TB):
        b = b0 + j
        tpos = tpos_ref[b]
        tlen = tlen_ref[b]
        fpos = fpos_ref[b]
        flen = flen_ref[b]

        # time mask (PyTorch dim=2) then freq mask (dim=1); zero-fill of the
        # union of masks is identical to applying them sequentially.
        time_mask = (t_idx >= tpos) & (t_idx < tpos + tlen)   # (1, T_pad)
        freq_mask = (f_idx >= fpos) & (f_idx < fpos + flen)   # (F_pad, 1)
        mask = time_mask | freq_mask                          # (F_pad, T_pad)

        o_ref[j] = jnp.where(mask, zero, x_ref[j])


def sample_mask_params(key, shape, freq_mask_width=(0, 8), time_mask_width=(0, 10)):
    """Replicates the torch.randint sampling semantics (upper bound exclusive,
    mask_pos upper bound = max(1, D - mask_len.max())) entirely on-device —
    no host round-trips, jit-friendly."""
    B, F_dim, T_dim = shape
    k1, k2, k3, k4 = jax.random.split(key, 4)

    # time mask (dim=2)
    tlen = jax.random.randint(k1, (B,), time_mask_width[0], time_mask_width[1],
                              dtype=jnp.int32)
    t_high = jnp.maximum(1, T_dim - jnp.max(tlen))
    tpos = jax.random.randint(k2, (B,), 0, t_high, dtype=jnp.int32)

    # freq mask (dim=1)
    flen = jax.random.randint(k3, (B,), freq_mask_width[0], freq_mask_width[1],
                              dtype=jnp.int32)
    f_high = jnp.maximum(1, F_dim - jnp.max(flen))
    fpos = jax.random.randint(k4, (B,), 0, f_high, dtype=jnp.int32)

    return tpos, tlen, fpos, flen


def fbank_aug_pallas(x, tpos, tlen, fpos, flen, *, target_block_bytes=1 << 20):
    B, F_dim, T_dim = x.shape

    # Pad freq to a multiple of 8 (sublanes) and time to a multiple of 128
    # (lanes) so loads/stores are full-width and unmasked.
    F_pad = ((F_dim + 7) // 8) * 8
    T_pad = ((T_dim + 127) // 128) * 128

    # Batch elements per grid step: aim for ~1 MiB blocks, cap the static
    # unroll, and pad the batch so the grid divides evenly.
    per_batch_bytes = F_pad * T_pad * x.dtype.itemsize
    TB = max(1, min(B, target_block_bytes // per_batch_bytes, 16))
    B_pad = ((B + TB - 1) // TB) * TB

    xp = jnp.pad(x, ((0, B_pad - B), (0, F_pad - F_dim), (0, T_pad - T_dim)))

    def pad1(a):
        return jnp.pad(a, (0, B_pad - B))

    tpos_p, tlen_p, fpos_p, flen_p = map(pad1, (tpos, tlen, fpos, flen))

    grid_spec = pltpu.PrefetchScalarGridSpec(
        num_scalar_prefetch=4,
        grid=(B_pad // TB,),
        in_specs=[pl.BlockSpec((TB, F_pad, T_pad), lambda g, *_: (g, 0, 0))],
        out_specs=pl.BlockSpec((TB, F_pad, T_pad), lambda g, *_: (g, 0, 0)),
    )

    out = pl.pallas_call(
        fbank_aug_kernel,
        out_shape=jax.ShapeDtypeStruct(xp.shape, xp.dtype),
        grid_spec=grid_spec,
        compiler_params=pltpu.CompilerParams(
            dimension_semantics=("parallel",),   # shards batch groups across TCs on v7x
            vmem_limit_bytes=32 * 1024 * 1024,   # plenty for 4x ~1 MiB double buffers
        ),
    )(tpos_p, tlen_p, fpos_p, flen_p, xp)

    return out[:B, :F_dim, :T_dim]


def fbank_aug_ref(x, tpos, tlen, fpos, flen):
    """Plain-JAX reference mirroring the PyTorch masked_fill semantics."""
    B, F_dim, T_dim = x.shape
    t = jnp.arange(T_dim)[None, None, :]
    f = jnp.arange(F_dim)[None, :, None]
    tp = tpos[:, None, None]
    tl = tlen[:, None, None]
    fp = fpos[:, None, None]
    fl = flen[:, None, None]
    time_mask = (t >= tp) & (t < tp + tl)
    freq_mask = (f >= fp) & (f < fp + fl)
    return jnp.where(time_mask | freq_mask, 0.0, x)


if __name__ == "__main__":
    key = jax.random.PRNGKey(0)
    k_x, k_m = jax.random.split(key)

    B, F_dim, T_dim = 2, 16, 32          # (batch, freq/mel bins, time frames)
    x = jax.random.normal(k_x, (B, F_dim, T_dim), dtype=jnp.float32)

    tpos, tlen, fpos, flen = sample_mask_params(k_m, (B, F_dim, T_dim))

    out = fbank_aug_pallas(x, tpos, tlen, fpos, flen)
    out = jax.block_until_ready(out)

    ref = fbank_aug_ref(x, tpos, tlen, fpos, flen)
    assert out.shape == x.shape and out.dtype == x.dtype
    assert jnp.allclose(out, ref), "Pallas output mismatch vs reference"

    print("KERNEL_OK")
</pallas_src>

<mosaic_0001>
module attributes {stable_mosaic.version = 11 : i64} {
  func.func @fbank_aug_kernel(%arg0: i32, %arg1: memref<2xi32, #tpu.memory_space<smem>>, %arg2: memref<2xi32, #tpu.memory_space<smem>>, %arg3: memref<2xi32, #tpu.memory_space<smem>>, %arg4: memref<2xi32, #tpu.memory_space<smem>>, %arg5: memref<2x16x128xf32, #tpu.memory_space<vmem>>, %arg6: memref<2x16x128xf32, #tpu.memory_space<vmem>>) attributes {dimension_semantics = [#tpu.dimension_semantics<parallel>], iteration_bounds = array<i64: 1>, scalar_prefetch = 4 : i64, scratch_operands = 0 : i64, tpu.core_type = #tpu.core_type<tc>, window_params = [{transform_indices = @transform_0, window_bounds = array<i64: 2, 16, 128>}, {transform_indices = @transform_1, window_bounds = array<i64: 2, 16, 128>}]} {
    %c2_i32 = arith.constant 2 : i32
    %0 = arith.muli %arg0, %c2_i32 : i32
    %1 = tpu.iota {dimensions = array<i32: 1>} : vector<1x128xi32>
    %2 = tpu.iota {dimensions = array<i32: 0>} : vector<16x1xi32>
    %c0_i32 = arith.constant 0 : i32
    %3 = arith.addi %0, %c0_i32 : i32
    %4 = arith.index_cast %3 : i32 to index
    %5 = memref.load %arg1[%4] : memref<2xi32, #tpu.memory_space<smem>>
    %6 = arith.index_cast %3 : i32 to index
    %7 = memref.load %arg2[%6] : memref<2xi32, #tpu.memory_space<smem>>
    %8 = arith.index_cast %3 : i32 to index
    %9 = memref.load %arg3[%8] : memref<2xi32, #tpu.memory_space<smem>>
    %10 = arith.index_cast %3 : i32 to index
    %11 = memref.load %arg4[%10] : memref<2xi32, #tpu.memory_space<smem>>
    %12 = vector.broadcast %5 : i32 to vector<1x128xi32>
    %13 = arith.cmpi sge, %1, %12 : vector<1x128xi32>
    %14 = arith.addi %5, %7 : i32
    %15 = vector.broadcast %14 : i32 to vector<1x128xi32>
    %16 = arith.cmpi slt, %1, %15 : vector<1x128xi32>
    %17 = arith.andi %13, %16 : vector<1x128xi1>
    %18 = vector.broadcast %9 : i32 to vector<16x1xi32>
    %19 = arith.cmpi sge, %2, %18 : vector<16x1xi32>
    %20 = arith.addi %9, %11 : i32
    %21 = vector.broadcast %20 : i32 to vector<16x1xi32>
    %22 = arith.cmpi slt, %2, %21 : vector<16x1xi32>
    %23 = arith.andi %19, %22 : vector<16x1xi1>
    %24 = vector.broadcast %17 : vector<1x128xi1> to vector<16x128xi1>
    %25 = vector.broadcast %23 : vector<16x1xi1> to vector<16x128xi1>
    %26 = arith.ori %24, %25 : vector<16x128xi1>
    %c0 = arith.constant 0 : index
    %c0_0 = arith.constant 0 : index
    %c0_1 = arith.constant 0 : index
    %27 = vector.load %arg5[%c0, %c0_0, %c0_1] : memref<2x16x128xf32, #tpu.memory_space<vmem>>, vector<1x16x128xf32>
    %28 = vector.shape_cast %27 : vector<1x16x128xf32> to vector<16x128xf32>
    %cst = arith.constant 0.000000e+00 : f32
    %29 = vector.broadcast %cst : f32 to vector<16x128xf32>
    %30 = arith.select %26, %29, %28 : vector<16x128xi1>, vector<16x128xf32>
    %c0_2 = arith.constant 0 : index
    %c0_3 = arith.constant 0 : index
    %c0_4 = arith.constant 0 : index
    %31 = vector.load %arg6[%c0_2, %c0_3, %c0_4] : memref<2x16x128xf32, #tpu.memory_space<vmem>>, vector<1x16x128xf32>
    %32 = vector.shape_cast %31 : vector<1x16x128xf32> to vector<16x128xf32>
    %33 = vector.shape_cast %30 : vector<16x128xf32> to vector<1x16x128xf32>
    tpu.vector_store %arg6[%c0_2, %c0_3, %c0_4], %33 {strides = array<i32>} : memref<2x16x128xf32, #tpu.memory_space<vmem>>, vector<1x16x128xf32>,
    %c1_i32 = arith.constant 1 : i32
    %34 = arith.addi %0, %c1_i32 : i32
    %35 = arith.index_cast %34 : i32 to index
    %36 = memref.load %arg1[%35] : memref<2xi32, #tpu.memory_space<smem>>
    %37 = arith.index_cast %34 : i32 to index
    %38 = memref.load %arg2[%37] : memref<2xi32, #tpu.memory_space<smem>>
    %39 = arith.index_cast %34 : i32 to index
    %40 = memref.load %arg3[%39] : memref<2xi32, #tpu.memory_space<smem>>
    %41 = arith.index_cast %34 : i32 to index
    %42 = memref.load %arg4[%41] : memref<2xi32, #tpu.memory_space<smem>>
    %43 = vector.broadcast %36 : i32 to vector<1x128xi32>
    %44 = arith.cmpi sge, %1, %43 : vector<1x128xi32>
    %45 = arith.addi %36, %38 : i32
    %46 = vector.broadcast %45 : i32 to vector<1x128xi32>
    %47 = arith.cmpi slt, %1, %46 : vector<1x128xi32>
    %48 = arith.andi %44, %47 : vector<1x128xi1>
    %49 = vector.broadcast %40 : i32 to vector<16x1xi32>
    %50 = arith.cmpi sge, %2, %49 : vector<16x1xi32>
    %51 = arith.addi %40, %42 : i32
    %52 = vector.broadcast %51 : i32 to vector<16x1xi32>
    %53 = arith.cmpi slt, %2, %52 : vector<16x1xi32>
    %54 = arith.andi %50, %53 : vector<16x1xi1>
    %55 = vector.broadcast %48 : vector<1x128xi1> to vector<16x128xi1>
    %56 = vector.broadcast %54 : vector<16x1xi1> to vector<16x128xi1>
    %57 = arith.ori %55, %56 : vector<16x128xi1>
    %c1 = arith.constant 1 : index
    %c0_5 = arith.constant 0 : index
    %c0_6 = arith.constant 0 : index
    %58 = vector.load %arg5[%c1, %c0_5, %c0_6] : memref<2x16x128xf32, #tpu.memory_space<vmem>>, vector<1x16x128xf32>
    %59 = vector.shape_cast %58 : vector<1x16x128xf32> to vector<16x128xf32>
    %cst_7 = arith.constant 0.000000e+00 : f32
    %60 = vector.broadcast %cst_7 : f32 to vector<16x128xf32>
    %61 = arith.select %57, %60, %59 : vector<16x128xi1>, vector<16x128xf32>
    %c1_8 = arith.constant 1 : index
    %c0_9 = arith.constant 0 : index
    %c0_10 = arith.constant 0 : index
    %62 = vector.load %arg6[%c1_8, %c0_9, %c0_10] : memref<2x16x128xf32, #tpu.memory_space<vmem>>, vector<1x16x128xf32>
    %63 = vector.shape_cast %62 : vector<1x16x128xf32> to vector<16x128xf32>
    %64 = vector.shape_cast %61 : vector<16x128xf32> to vector<1x16x128xf32>
    tpu.vector_store %arg6[%c1_8, %c0_9, %c0_10], %64 {strides = array<i32>} : memref<2x16x128xf32, #tpu.memory_space<vmem>>, vector<1x16x128xf32>,
    return
  }
  func.func @transform_0(%arg0: i32, %arg1: memref<2xi32, #tpu.memory_space<smem>>, %arg2: memref<2xi32, #tpu.memory_space<smem>>, %arg3: memref<2xi32, #tpu.memory_space<smem>>, %arg4: memref<2xi32, #tpu.memory_space<smem>>) -> (i32, i32, i32) {
    %c0_i32 = arith.constant 0 : i32
    %c0_i32_0 = arith.constant 0 : i32
    %c0_i32_1 = arith.constant 0 : i32
    return %arg0, %c0_i32, %c0_i32_0 : i32, i32, i32
  }
  func.func @transform_1(%arg0: i32, %arg1: memref<2xi32, #tpu.memory_space<smem>>, %arg2: memref<2xi32, #tpu.memory_space<smem>>, %arg3: memref<2xi32, #tpu.memory_space<smem>>, %arg4: memref<2xi32, #tpu.memory_space<smem>>) -> (i32, i32, i32) {
    %c0_i32 = arith.constant 0 : i32
    %c0_i32_0 = arith.constant 0 : i32
    %c0_i32_1 = arith.constant 0 : i32
    return %arg0, %c0_i32, %c0_i32_0 : i32, i32, i32
  }
}

</mosaic_0001>

<bundles_post_ra>
// kernel: tpu_custom_call.1
= control target key start
LH: loop header
LB: loop body
LE: loop exit
PB: predicated region body
PF: predicated region fallthrough
CT: control target
= control target key end

     0   :  { %s358_s0 = inlined_call_operand.hbm [shape: s32[2], index: 0, kind: input, shape index: {}]   ;;  %s359_s4 = inlined_call_operand.hbm [shape: f32[2,16,128], index: 4, kind: input, shape index: {}]   ;;  %s360_s5 = inlined_call_operand.hbm [shape: f32[2,16,128], index: 5, kind: output, shape index: {}]   ;;  %s361_s1 = inlined_call_operand.vmem [shape: s32[2], index: 1, kind: input, shape index: {}]   ;;  %s362_s2 = inlined_call_operand.vmem [shape: s32[2], index: 2, kind: input, shape index: {}]   ;;  %s363_s3 = inlined_call_operand.vmem [shape: s32[2], index: 3, kind: input, shape index: {}]  }
   0x1   :  { %s147_s20 = scalar_lea.hbm %s358_s0, 16 }
   0x2   :  { %p148_p0 = scmp.ne.s32.totalorder %s358_s0, %s147_s20  ;;  %p151_p1 = scmp.lt.u32.totalorder %s147_s20, %s358_s0 }
   0x4   :  { %p153_p2 = pnand %p151_p1, %p148_p0 }
   0x6   :  { %156 = shalt.err (!%p153_p2)  }
   0x7   :  { %s243_s25 = smov [#allocation3]   ;;  %s12_s30 = sshll.u32 %s361_s1, 4  ;;  %s13_s30 = int_to_ptr.vmem [resolvable:$true] %s12_s30 }
   0x8   :  { %11 = dma.hbm_to_smem %s358_s0, 16, %s243_s25, [#allocation2] }
   0x9   :  { %s16_s8 = sshll.u32 %s362_s2, 4  ;;  %s157_s9 = scalar_lea.vmem %s13_s30, 16  ;;  %s17_s8 = int_to_ptr.vmem [resolvable:$true] %s16_s8 }
   0xa   :  { %p158_p3 = scmp.ne.s32.totalorder %s13_s30, %s157_s9  ;;  %p162_p4 = scmp.lt.s32.totalorder %s13_s30, %s13_s30 }
   0xb   :  { %p163_p5 = scmp.lt.s32.totalorder %s157_s9, %s157_s9 }
   0xd   :  { %p164_p6 = por %p163_p5, %p162_p4 }
   0xf   :  { %p165_p7 = pnand %p164_p6, %p158_p3 }
  0x11   :  { %168 = shalt.err (!%p165_p7)  }
  0x12   :  { %s244_s10 = smov [#allocation4]   ;;  %s20_s12 = sshll.u32 %s363_s3, 4  ;;  %s21_s12 = int_to_ptr.vmem [resolvable:$true] %s20_s12 }
  0x13   :  { %15 = dma.vmem_to_smem %s13_s30, 16, %s244_s10, [#allocation2] }
  0x14   :  { %s169_s1 = scalar_lea.vmem %s17_s8, 16  ;;  %p174_p9 = scmp.lt.s32.totalorder %s17_s8, %s17_s8 }
  0x15   :  { %p170_p8 = scmp.ne.s32.totalorder %s17_s8, %s169_s1  ;;  %p175_p10 = scmp.lt.s32.totalorder %s169_s1, %s169_s1 }
  0x17   :  { %p176_p11 = por %p175_p10, %p174_p9 }
  0x19   :  { %p177_p12 = pnand %p176_p11, %p170_p8 }
  0x1b   :  { %180 = shalt.err (!%p177_p12)  }
  0x1c   :  { %s245_s2 = smov [#allocation5]   ;;  %s181_s13 = scalar_lea.vmem %s21_s12, 16 }
  0x1d   :  { %19 = dma.vmem_to_smem %s17_s8, 16, %s245_s2, [#allocation2] }
  0x1e   :  { %p182_p13 = scmp.ne.s32.totalorder %s21_s12, %s181_s13  ;;  %p186_p0 = scmp.lt.s32.totalorder %s21_s12, %s21_s12 }
  0x1f   :  { %p187_p1 = scmp.lt.s32.totalorder %s181_s13, %s181_s13 }
  0x21   :  { %p188_p2 = por %p187_p1, %p186_p0 }
  0x23   :  { %p189_p3 = pnand %p188_p2, %p182_p13 }
  0x25   :  { %192 = shalt.err (!%p189_p3)  }
  0x26   :  { %s246_s14 = smov [#allocation6]  }
  0x27   :  { %23 = dma.vmem_to_smem %s21_s12, 16, %s246_s14, [#allocation2] }
  0x28   :  { %237 = dma.done.wait [#allocation2], 64 }
  0x29   :  { %238 = vsyncadd [#allocation2], 4294967232 }
  0x2a   :  { %25 = sfence }
  0x2b   :  { %26 = vsyncpa [#allocation8], 0 }
  0x2c   :  { %27 = vsyncpa [#allocation9], 0  ;;  %s247_s3 = smov [#allocation7]   ;;  %s193_s18 = scalar_lea.hbm %s359_s4, 512 }
  0x2d   :  { %s33_s15 = sshll.u32 %s247_s3, 4  ;;  %p194_p4 = scmp.ne.s32.totalorder %s359_s4, %s193_s18  ;;  %s34_s15 = int_to_ptr.vmem [resolvable:$true] %s33_s15 }
  0x2e   :  { %p197_p5 = scmp.lt.u32.totalorder %s193_s18, %s359_s4 }
  0x30   :  { %p199_p6 = pnand %p197_p5, %p194_p4 }
  0x32   :  { %202 = shalt.err (!%p199_p6)
}
  0x33   :  { %s203_s23 = scalar_lea.vmem %s34_s15, 512  ;;  %p208_p8 = scmp.lt.s32.totalorder %s34_s15, %s34_s15 }
  0x34   :  { %p204_p7 = scmp.ne.s32.totalorder %s34_s15, %s203_s23  ;;  %p209_p9 = scmp.lt.s32.totalorder %s203_s23, %s203_s23 }
  0x36   :  { %p210_p10 = por %p209_p9, %p208_p8 }
  0x38   :  { %p211_p11 = pnand %p210_p10, %p204_p7 }
  0x3a   :  { %214 = shalt.err (!%p211_p11)
}
  0x3b   :  { %s248_s24 = smov 128   ;;  %s249_s25 = smov 8  }
  0x3c   :  { %39 = dma.hbm_to_vmem [thread:$0]  %s359_s4, 512, %s34_s15, [#allocation8], %s248_s24, %s248_s24, %s249_s25  }
  0x3d   :  { %239 = dma.done.wait [#allocation8], 512  }
  0x3e   :  { %240 = vsyncadd [#allocation8], 4294966784  ;;  %v44_v0 = vlaneseq  ;;  %s49_s28 = sld [smem:[#allocation3]]  ;;  %s135_s7 = sld [smem:[#allocation3 + $0x1]]  ;;  %v76_v10 = vld [vmem:[#allocation7] sm:$0xff]  ;;  %v77_v15 = vld [vmem:[#allocation7 + $0x8] sm:$0xff] }
  0x3f   :  { %s50_s29 = sld [smem:[#allocation4]]  ;;  %s136_s8 = sld [smem:[#allocation4 + $0x1]]  ;;  %v111_v19 = vld [vmem:[#allocation7 + $0x10] sm:$0xff]  ;;  %v112_v20 = vld [vmem:[#allocation7 + $0x18] sm:$0xff] }
  0x40   :  { %v47_v1 = vshrl.u32 %v44_v0, 7  ;;  %s51_s30 = sld [smem:[#allocation5]]  ;;  %v45_v2 = vand.u32 127, %v44_v0  ;;  %s317_s9 = sld [smem:[#allocation5 + $0x1]] }
  0x41   :  { %s52_s6 = sld [smem:[#allocation6]]  ;;  %s138_s10 = sld [smem:[#allocation6 + $0x1]] }
  0x42   :  { %v48_v3 = vadd.s32 8, %v47_v1  ;;  %s250_s1 = smov [#allocation10]  }
  0x43   :  { %s123_s2 = sshll.u32 %s250_s1, 4  ;;  %s124_s2 = int_to_ptr.vmem [resolvable:$true] %s123_s2 }
  0x44   :  { %v53_v4 = vstv %s49_s28  ;;  %v87_v11 = vstv %s135_s7  ;;  %s215_s13 = scalar_lea.vmem %s124_s2, 512  ;;  %p220_p13 = scmp.lt.s32.totalorder %s124_s2, %s124_s2 }
  0x45   :  { %s55_s0 = sadd.s32 %s50_s29, %s49_s28  ;;  %vm54_vm0 = vcmp.ge.s32.totalorder %v45_v2, %v53_v4  ;;  %s89_s11 = sadd.s32 %s136_s8, %s135_s7  ;;  %vm88_vm9 = vcmp.ge.s32.totalorder %v45_v2, %v87_v11 }
  0x46   :  { %v56_v5 = vstv %s55_s0  ;;  %v59_v6 = vstv %s51_s30  ;;  %v90_v12 = vstv %s89_s11  ;;  %v93_v13 = vstv %s317_s9  ;;  %p216_p12 = scmp.ne.s32.totalorder %s124_s2, %s215_s13  ;;  %p221_p0 = scmp.lt.s32.totalorder %s215_s13, %s215_s13 }
  0x47   :  { %s62_s4 = sadd.s32 %s52_s6, %s51_s30  ;;  %vm57_vm1 = vcmp.lt.s32.totalorder %v45_v2, %v56_v5  ;;  %vm60_vm2 = vcmp.ge.s32.totalorder %v47_v1, %v59_v6  ;;  %vm319_vm3 = vcmp.ge.s32.totalorder %v48_v3, %v59_v6  ;;  %s96_s12 = sadd.s32 %s138_s10, %s317_s9  ;;  %vm91_vm10 = vcmp.lt.s32.totalorder %v45_v2, %v90_v12 }
  0x48   :  { %v63_v7 = vstv %s62_s4  ;;  %vm323_vm4 = vmand %vm54_vm0, %vm57_vm1  ;;  %v97_v14 = vstv %s96_s12  ;;  %vm94_vm12 = vcmp.ge.s32.totalorder %v47_v1, %v93_v13  ;;  %vm95_vm0 = vcmp.ge.s32.totalorder %v48_v3, %v93_v13  ;;  %p222_p1 = por %p221_p0, %p220_p13 }
  0x49   :  { %vm64_vm5 = vcmp.lt.s32.totalorder %v47_v1, %v63_v7  ;;  %vm65_vm6 = vcmp.lt.s32.totalorder %v48_v3, %v63_v7  ;;  %vm98_vm13 = vcmp.lt.s32.totalorder %v47_v1, %v97_v14  ;;  %vm335_vm15 = vmand %vm88_vm9, %vm91_vm10  ;;  %vm99_vm1 = vcmp.lt.s32.totalorder %v48_v3, %v97_v14 }
  0x4a   :  { %vm66_vm7 = vmand %vm60_vm2, %vm64_vm5  ;;  %p223_p2 = pnand %p222_p1, %p216_p12 }
  0x4b   :  { %vm74_vm8 = vmor %vm323_vm4, %vm66_vm7 }
  0x4c   :  { %v78_v16 = vsel %vm74_vm8, 0.0, %v76_v10  ;;  %vm67_vm11 = vmand %vm319_vm3, %vm65_vm6 }
  0x4d   :  { %80 = vst [vmem:[#allocation10] sm:$0xff] %v78_v16  ;;  %vm75_vm14 = vmor %vm323_vm4, %vm67_vm11 }
  0x4e   :  { %v79_v17 = vsel %vm75_vm14, 0.0, %v77_v15  ;;  %vm100_vm2 = vmand %vm94_vm12, %vm98_vm13 }
  0x4f   :  { %81 = vst [vmem:[#allocation10 + $0x8] sm:$0xff] %v79_v17  ;;  %vm108_vm3 = vmor %vm335_vm15, %vm100_vm2 }
  0x50   :  { %v113_v21 = vsel %vm108_vm3, 0.0, %v111_v19  ;;  %vm101_vm5 = vmand %vm95_vm0, %vm99_vm1 }
  0x51   :  { %116 = vst [vmem:[#allocation10 + $0x10] sm:$0xff] %v113_v21  ;;  %vm109_vm4 = vmor %vm335_vm15, %vm101_vm5 }
  0x52   :  { %v114_v22 = vsel %vm109_vm4, 0.0, %v112_v20 }
  0x53   :  { %117 = vst [vmem:[#allocation10 + $0x18] sm:$0xff] %v114_v22 }
  0x54   :  { %226 = shalt.err (!%p223_p2)
}
  0x55   :  { %s227_s15 = scalar_lea.hbm %s360_s5, 512 }
  0x56   :  { %p228_p3 = scmp.ne.s32.totalorder %s360_s5, %s227_s15  ;;  %p231_p4 = scmp.lt.u32.totalorder %s227_s15, %s360_s5 }
  0x58   :  { %p233_p5 = pnand %p231_p4, %p228_p3 }
  0x5a   :  { %236 = shalt.err (!%p233_p5)
}
  0x5b   :  { %129 = dma.vmem_to_hbm [thread:$0]  %s124_s2, 512, %s360_s5, [#allocation9], %s248_s24, %s248_s24, %s249_s25  }
  0x5c   :  { %241 = dma.done.wait [#allocation9], 512  }
  0x5d   :  { %242 = vsyncadd [#allocation9], 4294966784 }
  0x5e   :  { %133 = vsyncpa [#allocation8], 1 }
  0x5f   :  { %134 = vsyncpa [#allocation9], 1 }

</bundles_post_ra>
